<compile_context>
chip_gen: v7x
topology: tpu7x:2x2x1
jax: 0.10.0
libtpu: 0.0.40
codegen_flags: <defaults>
</compile_context>

<pallas_src>
import functools

import jax
import jax.numpy as jnp
from jax import lax
from jax.experimental import pallas as pl
from jax.experimental.pallas import tpu as pltpu


_LANE_CHOICES = (512, 256, 128)      # lane widths tried (multiples of 128)
_TARGET_BLOCK_BYTES = 4 << 20        # ~4 MiB per-input block (review guidance)


def _round_up(x, m):
    return (x + m - 1) // m * m


# ---------------------------------------------------------------------------
# Kernel: running sum(|pred_blk - gt_blk|) into an (8, 128) f32 accumulator.
# ---------------------------------------------------------------------------
def _sum_abs_diff_kernel(pred_ref, gt_ref, out_ref, acc_ref, *,
                         block_rows, lane, bpc, total_rows, needs_mask):
    c = pl.program_id(0)            # parallel (core) axis
    i = pl.program_id(1)            # arbitrary (reduction) axis

    @pl.when(i == 0)
    def _init():
        acc_ref[...] = jnp.zeros_like(acc_ref)

    if needs_mask:
        blk = c * bpc + i           # un-clamped global block id
        valid_rows = jnp.clip(total_rows - blk * block_rows, 0, block_rows)

    n_stripes = block_rows // 8

    def body(s, acc):
        r = pl.multiple_of(s * 8, 8)
        # Subtraction promotes to the wider of the two input dtypes (matches
        # PyTorch); widen to f32 only for accumulation.
        d = jnp.abs(pred_ref[pl.ds(r, 8), :] -
                    gt_ref[pl.ds(r, 8), :]).astype(jnp.float32)   # (8, lane)
        if needs_mask:
            # valid_rows is a multiple of 8, so masking at stripe granularity
            # is exact.  Select (not multiply) so garbage rows never leak.
            d = jnp.where(s * 8 < valid_rows, d, 0.0)
        return acc + d

    stripe_sum = lax.fori_loop(0, n_stripes, body,
                               jnp.zeros((8, lane), jnp.float32),
                               unroll=min(4, n_stripes))           # (8, lane)

    # Fold 128-wide lane groups into one (8, 128) vreg tile (VPU adds only).
    folded = stripe_sum[:, 0:128]
    for g in range(1, lane // 128):
        folded = folded + stripe_sum[:, g * 128:(g + 1) * 128]

    acc_ref[...] += folded

    @pl.when(i == pl.num_programs(1) - 1)
    def _finalize():
        out_ref[...] = acc_ref[...]


# ---------------------------------------------------------------------------
# Wrapper: sum(|pred - gt|) over all elements of one pyramid scale.
# ---------------------------------------------------------------------------
def _sum_abs_diff(pred, gt, *, target_block_bytes=_TARGET_BLOCK_BYTES):
    n = int(pred.size)
    p_flat = pred.reshape(-1)
    g_flat = gt.reshape(-1)

    lane = next((l for l in _LANE_CHOICES if n % (8 * l) == 0), None)
    if lane is None:
        # TODO(synk): only tiny/odd scales hit this cheap zero-pad fallback.
        lane = 128
        n_pad = _round_up(n, 8 * lane)
        p_flat = jnp.pad(p_flat, (0, n_pad - n))
        g_flat = jnp.pad(g_flat, (0, n_pad - n))
        n = n_pad

    rows = n // lane                                   # multiple of 8
    itemsize = max(p_flat.dtype.itemsize, g_flat.dtype.itemsize)
    block_rows = min(rows, max(8, (target_block_bytes // (lane * itemsize))
                               // 8 * 8))
    n_blocks = (rows + block_rows - 1) // block_rows
    n_cores = 2 if n_blocks >= 2 else 1
    bpc = (n_blocks + n_cores - 1) // n_cores
    needs_mask = (rows % block_rows != 0) or (bpc * n_cores != n_blocks)

    p2d = p_flat.reshape(rows, lane)                   # free bitcast reshape
    g2d = g_flat.reshape(rows, lane)

    def in_idx(c, i):
        # Clamp so padding blocks of the core split never DMA out of bounds;
        # their contribution is killed by the in-kernel mask.
        return (jnp.minimum(c * bpc + i, n_blocks - 1), 0)

    kernel = functools.partial(
        _sum_abs_diff_kernel,
        block_rows=block_rows, lane=lane, bpc=bpc,
        total_rows=rows, needs_mask=needs_mask)

    block_bytes = block_rows * lane * (p_flat.dtype.itemsize +
                                       g_flat.dtype.itemsize)
    vmem_limit = min(max(2 * block_bytes + (8 << 20), 16 << 20), 48 << 20)

    in_bytes = (p2d.size * p2d.dtype.itemsize + g2d.size * g2d.dtype.itemsize)

    partials = pl.pallas_call(
        kernel,
        out_shape=jax.ShapeDtypeStruct((n_cores * 8, 128), jnp.float32),
        grid=(n_cores, bpc),
        in_specs=[pl.BlockSpec((block_rows, lane), in_idx),
                  pl.BlockSpec((block_rows, lane), in_idx)],
        out_specs=pl.BlockSpec((8, 128), lambda c, i: (c, 0)),
        scratch_shapes=[pltpu.VMEM((8, 128), jnp.float32)],
        compiler_params=pltpu.CompilerParams(
            dimension_semantics=("parallel", "arbitrary"),
            vmem_limit_bytes=vmem_limit),
        cost_estimate=pl.CostEstimate(
            flops=3 * rows * lane, transcendentals=0,
            bytes_accessed=in_bytes + n_cores * 8 * 128 * 4),
    )(p2d, g2d)

    # One tiny XLA reduce over the (n_cores*8, 128) partial sums.
    return jnp.sum(partials)


# ---------------------------------------------------------------------------
# F.interpolate(..., mode='nearest') equivalent (index selection / glue only).
# Integer downsample factors (and identity) lower to a strided slice — no
# gather materialized.  TODO(synk): the fully fused in-kernel strided gt read
# has no clean lane-dense Pallas TPU path, so index selection stays in XLA.
# ---------------------------------------------------------------------------
def nearest_resize(x, out_h, out_w):
    B, C, H, W = x.shape
    if (H, W) == (out_h, out_w):
        return x
    if H % out_h == 0 and W % out_w == 0:
        # PyTorch 'nearest': src = floor(i * H/out_h) = i * (H // out_h).
        return x[:, :, :: H // out_h, :: W // out_w]
    ih = jnp.minimum(
        jnp.floor(jnp.arange(out_h) * (H / out_h)).astype(jnp.int32), H - 1)
    iw = jnp.minimum(
        jnp.floor(jnp.arange(out_w) * (W / out_w)).astype(jnp.int32), W - 1)
    return x[:, :, ih][:, :, :, iw]


# ---------------------------------------------------------------------------
# AttnReconLoss.forward
# ---------------------------------------------------------------------------
DEFAULT_WEIGHTS = {8: 1, 16: 0.5, 32: 0.25, 64: 0.125,
                   128: 0.0625, 256: 1 / 32, 512: 1 / 64}


def attn_recon_loss(attn_dict, gt_image, weights=DEFAULT_WEIGHTS):
    warped_image = attn_dict['transport_image']
    if isinstance(warped_image, (list, tuple)):
        wsum = 0.0
        for item in warped_image:
            wsum += weights[item.shape[2]]
        loss = jnp.float32(0.0)
        for item in warped_image:
            h, w = item.shape[2], item.shape[3]
            gt_ = lax.stop_gradient(nearest_resize(gt_image, h, w))
            # loss = sum_s weights[h_s] * mean_s / wsum
            factor = weights[h] / (float(item.size) * wsum)
            loss = loss + _sum_abs_diff(item, gt_) * factor
        return loss
    else:
        h, w = warped_image.shape[2], warped_image.shape[3]
        gt_ = nearest_resize(gt_image, h, w)   # PyTorch: no detach here
        return _sum_abs_diff(warped_image, gt_) / float(warped_image.size)


# ---------------------------------------------------------------------------
# Pure-JAX reference for validation (general gather path everywhere).
# ---------------------------------------------------------------------------
def _ref_nearest(x, out_h, out_w):
    B, C, H, W = x.shape
    ih = jnp.minimum(
        jnp.floor(jnp.arange(out_h) * (H / out_h)).astype(jnp.int32), H - 1)
    iw = jnp.minimum(
        jnp.floor(jnp.arange(out_w) * (W / out_w)).astype(jnp.int32), W - 1)
    return x[:, :, ih][:, :, :, iw]


def _ref_loss(attn_dict, gt_image, weights=DEFAULT_WEIGHTS):
    warped_image = attn_dict['transport_image']
    if isinstance(warped_image, (list, tuple)):
        loss, wsum = 0.0, 0.0
        for item in warped_image:
            h, w = item.shape[2], item.shape[3]
            gt_ = _ref_nearest(gt_image, h, w)
            loss = loss + jnp.mean(jnp.abs(item - gt_)) * weights[h]
            wsum += weights[h]
        return loss / wsum
    h, w = warped_image.shape[2], warped_image.shape[3]
    return jnp.mean(jnp.abs(warped_image - _ref_nearest(gt_image, h, w)))


if __name__ == "__main__":
    key = jax.random.PRNGKey(0)
    k_gt, k_w8, k_w16, k_a, k_b = jax.random.split(key, 5)

    B, C = 2, 4
    gt_image = jax.random.normal(k_gt, (B, C, 16, 16), dtype=jnp.float32)
    # Multi-scale warped-image pyramid (list branch of forward()).
    warped_list = [
        jax.random.normal(k_w8, (B, C, 8, 8), dtype=jnp.float32),
        jax.random.normal(k_w16, (B, C, 16, 16), dtype=jnp.float32),
    ]

    # List case.
    attn_dict = {'transport_image': warped_list}
    loss_list = jax.block_until_ready(attn_recon_loss(attn_dict, gt_image))
    ref_list = jax.block_until_ready(_ref_loss(attn_dict, gt_image))

    # Single-tensor case.
    attn_dict_single = {'transport_image': warped_list[0]}
    loss_single = jax.block_until_ready(
        attn_recon_loss(attn_dict_single, gt_image))
    ref_single = jax.block_until_ready(
        _ref_loss(attn_dict_single, gt_image))

    assert jnp.allclose(loss_list, ref_list, atol=1e-5, rtol=1e-5), \
        (loss_list, ref_list)
    assert jnp.allclose(loss_single, ref_single, atol=1e-5, rtol=1e-5), \
        (loss_single, ref_single)

    # Extra coverage of the multi-block / masked-tail / 2-core / mixed-dtype
    # path using a small forced block size (production sizes hit it naturally).
    a = jax.random.normal(k_a, (B, C, 8, 40), dtype=jnp.float32
                          ).astype(jnp.bfloat16)
    b = jax.random.normal(k_b, (B, C, 8, 40), dtype=jnp.float32)
    got = jax.block_until_ready(_sum_abs_diff(a, b, target_block_bytes=4096))
    want = jax.block_until_ready(
        jnp.sum(jnp.abs(a.astype(jnp.float32) - b)))
    assert jnp.allclose(got, want, rtol=1e-4, atol=1e-2), (got, want)

    print("KERNEL_OK")
</pallas_src>

<mosaic_0001>
module attributes {stable_mosaic.version = 11 : i64} {
  func.func @_sum_abs_diff_kernel(%arg0: i32, %arg1: i32, %arg2: memref<8x128xf32, #tpu.memory_space<vmem>>, %arg3: memref<8x128xf32, #tpu.memory_space<vmem>>, %arg4: memref<8x128xf32, #tpu.memory_space<vmem>>, %arg5: memref<8x128xf32, #tpu.memory_space<vmem>>) attributes {dimension_semantics = [#tpu.dimension_semantics<parallel>, #tpu.dimension_semantics<arbitrary>], iteration_bounds = array<i64: 1, 1>, scalar_prefetch = 0 : i64, scratch_operands = 1 : i64, tpu.core_type = #tpu.core_type<tc>, window_params = [{transform_indices = @transform_0, window_bounds = array<i64: 8, 128>}, {transform_indices = @transform_1, window_bounds = array<i64: 8, 128>}, {transform_indices = @transform_2, window_bounds = array<i64: 8, 128>}]} {
    %c0_i32 = arith.constant 0 : i32
    %0 = arith.cmpi eq, %arg1, %c0_i32 : i32
    %1 = arith.extui %0 : i1 to i32
    %c0_i32_0 = arith.constant 0 : i32
    %2 = arith.cmpi ne, %1, %c0_i32_0 : i32
    scf.if %2 {
      %cst_9 = arith.constant 0.000000e+00 : f32
      %19 = vector.broadcast %cst_9 : f32 to vector<8x128xf32>
      %c0_10 = arith.constant 0 : index
      %c0_11 = arith.constant 0 : index
      %20 = vector.load %arg5[%c0_10, %c0_11] : memref<8x128xf32, #tpu.memory_space<vmem>>, vector<8x128xf32>
      tpu.vector_store %arg5[%c0_10, %c0_11], %19 {strides = array<i32>} : memref<8x128xf32, #tpu.memory_space<vmem>>, vector<8x128xf32>,
    } else {
    }
    %cst = arith.constant 0.000000e+00 : f32
    %3 = vector.broadcast %cst : f32 to vector<8x128xf32>
    %c0_i32_1 = arith.constant 0 : i32
    %c8_i32 = arith.constant 8 : i32
    %4 = arith.muli %c0_i32_1, %c8_i32 : i32
    %5 = tpu.assume_multiple %4, 8 : i32
    %6 = arith.index_cast %5 : i32 to index
    %c0 = arith.constant 0 : index
    %7 = vector.load %arg2[%6, %c0] : memref<8x128xf32, #tpu.memory_space<vmem>>, vector<8x128xf32>
    %8 = arith.index_cast %5 : i32 to index
    %c0_2 = arith.constant 0 : index
    %9 = vector.load %arg3[%8, %c0_2] : memref<8x128xf32, #tpu.memory_space<vmem>>, vector<8x128xf32>
    %10 = arith.subf %7, %9 : vector<8x128xf32>
    %11 = math.absf %10 : vector<8x128xf32>
    %12 = arith.addf %3, %11 : vector<8x128xf32>
    %c1_i32 = arith.constant 1 : i32
    %c0_3 = arith.constant 0 : index
    %c0_4 = arith.constant 0 : index
    %13 = vector.load %arg5[%c0_3, %c0_4] : memref<8x128xf32, #tpu.memory_space<vmem>>, vector<8x128xf32>
    %14 = arith.addf %13, %12 : vector<8x128xf32>
    %c0_5 = arith.constant 0 : index
    %c0_6 = arith.constant 0 : index
    %15 = vector.load %arg5[%c0_5, %c0_6] : memref<8x128xf32, #tpu.memory_space<vmem>>, vector<8x128xf32>
    tpu.vector_store %arg5[%c0_5, %c0_6], %14 {strides = array<i32>} : memref<8x128xf32, #tpu.memory_space<vmem>>, vector<8x128xf32>,
    %c0_i32_7 = arith.constant 0 : i32
    %16 = arith.cmpi eq, %arg1, %c0_i32_7 : i32
    %17 = arith.extui %16 : i1 to i32
    %c0_i32_8 = arith.constant 0 : i32
    %18 = arith.cmpi ne, %17, %c0_i32_8 : i32
    scf.if %18 {
      %c0_9 = arith.constant 0 : index
      %c0_10 = arith.constant 0 : index
      %19 = vector.load %arg5[%c0_9, %c0_10] : memref<8x128xf32, #tpu.memory_space<vmem>>, vector<8x128xf32>
      %c0_11 = arith.constant 0 : index
      %c0_12 = arith.constant 0 : index
      %20 = vector.load %arg4[%c0_11, %c0_12] : memref<8x128xf32, #tpu.memory_space<vmem>>, vector<8x128xf32>
      tpu.vector_store %arg4[%c0_11, %c0_12], %19 {strides = array<i32>} : memref<8x128xf32, #tpu.memory_space<vmem>>, vector<8x128xf32>,
    } else {
    }
    return
  }
  func.func @transform_0(%arg0: i32, %arg1: i32) -> (i32, i32) {
    %c1_i32 = arith.constant 1 : i32
    %0 = arith.muli %arg0, %c1_i32 : i32
    %1 = arith.addi %0, %arg1 : i32
    %c0_i32 = arith.constant 0 : i32
    %2 = arith.minsi %1, %c0_i32 : i32
    %c0_i32_0 = arith.constant 0 : i32
    %c0_i32_1 = arith.constant 0 : i32
    return %2, %c0_i32_0 : i32, i32
  }
  func.func @transform_1(%arg0: i32, %arg1: i32) -> (i32, i32) {
    %c1_i32 = arith.constant 1 : i32
    %0 = arith.muli %arg0, %c1_i32 : i32
    %1 = arith.addi %0, %arg1 : i32
    %c0_i32 = arith.constant 0 : i32
    %2 = arith.minsi %1, %c0_i32 : i32
    %c0_i32_0 = arith.constant 0 : i32
    %c0_i32_1 = arith.constant 0 : i32
    return %2, %c0_i32_0 : i32, i32
  }
  func.func @transform_2(%arg0: i32, %arg1: i32) -> (i32, i32) {
    %c0_i32 = arith.constant 0 : i32
    %c0_i32_0 = arith.constant 0 : i32
    return %arg0, %c0_i32 : i32, i32
  }
}

</mosaic_0001>

<bundles_post_ra>
// kernel: tpu_custom_call.1
= control target key start
LH: loop header
LB: loop body
LE: loop exit
PB: predicated region body
PF: predicated region fallthrough
CT: control target
= control target key end

     0   :  { %7 = vsyncpa [#allocation4], 0  ;;  %s219_s0 = inlined_call_operand.hbm [shape: f32[8,128], index: 0, kind: input, shape index: {}]   ;;  %s220_s1 = inlined_call_operand.hbm [shape: f32[8,128], index: 1, kind: input, shape index: {}]   ;;  %s221_s2 = inlined_call_operand.hbm [shape: f32[8,128], index: 2, kind: output, shape index: {}]  }
   0x1   :  { %8 = vsyncpa [#allocation7], 0 }
   0x2   :  { %9 = vsyncpa [#allocation5], 0  ;;  %s165_s9 = smov [#allocation3]   ;;  %s166_s11 = smov [#allocation6]  }
   0x3   :  { %s21_s10 = sshll.u32 %s165_s9, 4  ;;  %s36_s12 = sshll.u32 %s166_s11, 4  ;;  %s22_s10 = int_to_ptr.vmem [resolvable:$true] %s21_s10  ;;  %s37_s12 = int_to_ptr.vmem [resolvable:$true] %s36_s12 }
   0x4   :  { %s93_s15 = scalar_lea.hbm %s219_s0, 128 }
   0x5   :  { %p94_p0 = scmp.ne.s32.totalorder %s219_s0, %s93_s15  ;;  %p97_p1 = scmp.lt.u32.totalorder %s93_s15, %s219_s0 }
   0x7   :  { %p99_p2 = pnand %p97_p1, %p94_p0 }
   0x9   :  { %102 = shalt.err (!%p99_p2)
}
   0xa   :  { %s103_s20 = scalar_lea.vmem %s22_s10, 128  ;;  %p108_p4 = scmp.lt.s32.totalorder %s22_s10, %s22_s10 }
   0xb   :  { %p104_p3 = scmp.ne.s32.totalorder %s22_s10, %s103_s20  ;;  %p109_p5 = scmp.lt.s32.totalorder %s103_s20, %s103_s20 }
   0xd   :  { %p110_p6 = por %p109_p5, %p108_p4 }
   0xf   :  { %p111_p7 = pnand %p110_p6, %p104_p3 }
  0x11   :  { %114 = shalt.err (!%p111_p7)
}
  0x12   :  { %24 = dma.hbm_to_vmem [thread:$0]  %s219_s0, 128, %s22_s10, [#allocation4]  }
  0x13   :  { %s115_s25 = scalar_lea.hbm %s220_s1, 128 }
  0x14   :  { %p116_p8 = scmp.ne.s32.totalorder %s220_s1, %s115_s25  ;;  %p119_p9 = scmp.lt.u32.totalorder %s115_s25, %s220_s1 }
  0x16   :  { %p121_p10 = pnand %p119_p9, %p116_p8 }
  0x18   :  { %124 = shalt.err (!%p121_p10)
}
  0x19   :  { %s125_s30 = scalar_lea.vmem %s37_s12, 128  ;;  %p130_p12 = scmp.lt.s32.totalorder %s37_s12, %s37_s12 }
  0x1a   :  { %p126_p11 = scmp.ne.s32.totalorder %s37_s12, %s125_s30  ;;  %p131_p13 = scmp.lt.s32.totalorder %s125_s30, %s125_s30 }
  0x1c   :  { %p132_p0 = por %p131_p13, %p130_p12 }
  0x1e   :  { %p133_p1 = pnand %p132_p0, %p126_p11 }
  0x20   :  { %136 = shalt.err (!%p133_p1)
}
  0x21   :  { %39 = dma.hbm_to_vmem [thread:$0]  %s220_s1, 128, %s37_s12, [#allocation7]  }
  0x22   :  { %159 = dma.done.wait [#allocation4], 128  }
  0x23   :  { %160 = vsyncadd [#allocation4], 4294967168 }
  0x24   :  { %161 = dma.done.wait [#allocation7], 128  }
  0x25   :  { %162 = vsyncadd [#allocation7], 4294967168  ;;  %v57_v0 = vld [vmem:[#allocation3] sm:$0xff]  ;;  %v58_v1 = vld [vmem:[#allocation6] sm:$0xff]  ;;  %s167_s4 = smov [#allocation8]  }
  0x26   :  { %s76_s5 = sshll.u32 %s167_s4, 4  ;;  %v59_v2 = vsub.f32 %v57_v0, %v58_v1  ;;  %s77_s5 = int_to_ptr.vmem [resolvable:$true] %s76_s5 }
  0x27   :  { %s137_s6 = scalar_lea.vmem %s77_s5, 128  ;;  %p142_p3 = scmp.lt.s32.totalorder %s77_s5, %s77_s5 }
  0x28   :  { %v60_v3 = vand.u32 2147483647, %v59_v2  ;;  %p138_p2 = scmp.ne.s32.totalorder %s77_s5, %s137_s6  ;;  %p143_p4 = scmp.lt.s32.totalorder %s137_s6, %s137_s6 }
  0x2a   :  { %69 = vst [vmem:[#allocation8] sm:$0xff] %v60_v3  ;;  %p144_p5 = por %p143_p4, %p142_p3 }
  0x2c   :  { %p145_p6 = pnand %p144_p5, %p138_p2 }
  0x2e   :  { %148 = shalt.err (!%p145_p6)
}
  0x2f   :  { %s149_s8 = scalar_lea.hbm %s221_s2, 128 }
  0x30   :  { %p150_p7 = scmp.ne.s32.totalorder %s221_s2, %s149_s8  ;;  %p153_p8 = scmp.lt.u32.totalorder %s149_s8, %s221_s2 }
  0x32   :  { %p155_p9 = pnand %p153_p8, %p150_p7 }
  0x34   :  { %158 = shalt.err (!%p155_p9)
}
  0x35   :  { %79 = dma.vmem_to_hbm [thread:$0]  %s77_s5, 128, %s221_s2, [#allocation5]  }
  0x36   :  { %163 = dma.done.wait [#allocation5], 128  }
  0x37   :  { %164 = vsyncadd [#allocation5], 4294967168 }
  0x38   :  { %83 = vsyncpa [#allocation4], 1 }
  0x39   :  { %84 = vsyncpa [#allocation7], 1 }
  0x3a   :  { %85 = vsyncpa [#allocation5], 1 }

</bundles_post_ra>
